<compile_context>
chip_gen: v6e
topology: v6e:2x2x1
jax: 0.10.0
libtpu: 0.0.40
codegen_flags: <defaults>
</compile_context>

<pallas_src>
import functools

import jax
import jax.numpy as jnp
from jax.experimental import pallas as pl
from jax.experimental.pallas import tpu as pltpu


def _round_up(a: int, b: int) -> int:
    return (a + b - 1) // b * b


# --------------------------------------------------------------------------- #
# Kernels
# --------------------------------------------------------------------------- #
def _resident_kernel(emb_ref, x_ref, w1e_ref, w1x_ref, b1_ref, w2_ref, b2_ref,
                     out_ref, *, k_x):
    """Grid = (row_tiles,).  W1 / W2 / biases have constant block indices ->
    VMEM-resident (DMA'd once); only the x / batchEmb row tiles and the output
    stream through HBM."""
    mm_dtype = w1x_ref.dtype
    x_t = x_ref[...].astype(mm_dtype)
    if k_x != x_t.shape[-1]:
        # The x block is lane-padded past num_gene (boundary block): zero the
        # out-of-range columns so HBM garbage never reaches the MXU (the
        # matching W1 rows are zero-padded in prepare_params).
        col = jax.lax.broadcasted_iota(jnp.int32, x_t.shape, 1)
        x_t = jnp.where(col < k_x, x_t, jnp.zeros_like(x_t))
    # Layer 1: batch-embedding part (128-lane padded) + gene-expression part.
    h = jnp.dot(emb_ref[...], w1e_ref[...], preferred_element_type=jnp.float32)
    h = h + jnp.dot(x_t, w1x_ref[...], preferred_element_type=jnp.float32)
    h = jnp.maximum(h + b1_ref[...], 0.0)
    # Layer 2, lane-dense store.
    out_ref[...] = (jnp.dot(h.astype(w2_ref.dtype), w2_ref[...],
                            preferred_element_type=jnp.float32)
                    + b2_ref[...]).astype(out_ref.dtype)


def _kgrid_kernel(emb_ref, x_ref, w1e_ref, w1x_ref, b1_ref, w2_ref, b2_ref,
                  out_ref, h_acc, *, k_x, block_k):
    """Grid = (row_tiles [parallel], k_tiles [arbitrary]).  Layer-1 is reduced
    over the K axis into a f32 VMEM accumulator; bias + ReLU + layer-2 run on
    the last K step."""
    k = pl.program_id(1)
    mm_dtype = w1x_ref.dtype

    @pl.when(k == 0)
    def _init():
        # The (tiny) batch-embedding contribution doubles as the acc init.
        h_acc[...] = jnp.dot(emb_ref[...], w1e_ref[...],
                             preferred_element_type=jnp.float32)

    x_t = x_ref[...].astype(mm_dtype)
    w1_t = w1x_ref[...]
    if k_x % block_k != 0:
        # Ragged last K block (x is NOT padded in HBM): zero the out-of-range
        # K range of both operands so garbage never pollutes the reduction.
        valid = k_x - k * block_k
        col = jax.lax.broadcasted_iota(jnp.int32, x_t.shape, 1)
        x_t = jnp.where(col < valid, x_t, jnp.zeros_like(x_t))
        row = jax.lax.broadcasted_iota(jnp.int32, w1_t.shape, 0)
        w1_t = jnp.where(row < valid, w1_t, jnp.zeros_like(w1_t))
    h_acc[...] += jnp.dot(x_t, w1_t, preferred_element_type=jnp.float32)

    @pl.when(k == pl.num_programs(1) - 1)
    def _fin():
        h = jnp.maximum(h_acc[...] + b1_ref[...], 0.0)
        out_ref[...] = (jnp.dot(h.astype(w2_ref.dtype), w2_ref[...],
                                preferred_element_type=jnp.float32)
                        + b2_ref[...]).astype(out_ref.dtype)


# --------------------------------------------------------------------------- #
# Weight preparation (hoisted out of the per-call path)
# --------------------------------------------------------------------------- #
def prepare_params(w1, b1, w2, b2, num_batches, *, matmul_dtype=jnp.bfloat16):
    """Pad + cast module_encX's weights once; reuse the result across calls.

    w1: [num_batches + num_gene, hidden], b1: [hidden]
    w2: [hidden, dim_xbar],               b2: [dim_xbar]
    """
    k_in, hidden = w1.shape
    hidden2, dim_xbar = w2.shape
    assert hidden2 == hidden and b1.shape == (hidden,) and b2.shape == (dim_xbar,)
    assert 0 < num_batches < k_in
    k_x = k_in - num_batches

    hidden_p = _round_up(hidden, 128)
    dim_xbar_p = _round_up(dim_xbar, 128)
    nb_p = _round_up(num_batches, 128)     # 128-lane block for the batch-emb matmul
    k_xp = _round_up(k_x, 128)             # lane-aligned gene-feature contraction

    w1e = jnp.pad(w1[:num_batches],
                  ((0, nb_p - num_batches), (0, hidden_p - hidden))).astype(matmul_dtype)
    w1x = jnp.pad(w1[num_batches:],
                  ((0, k_xp - k_x), (0, hidden_p - hidden))).astype(matmul_dtype)
    b1p = jnp.pad(b1.reshape(1, hidden),
                  ((0, 0), (0, hidden_p - hidden))).astype(jnp.float32)
    w2p = jnp.pad(w2, ((0, hidden_p - hidden),
                       (0, dim_xbar_p - dim_xbar))).astype(matmul_dtype)
    b2p = jnp.pad(b2.reshape(1, dim_xbar),
                  ((0, 0), (0, dim_xbar_p - dim_xbar))).astype(jnp.float32)

    return dict(w1e=w1e, w1x=w1x, b1=b1p, w2=w2p, b2=b2p,
                num_batches=num_batches, nb_p=nb_p, k_x=k_x, k_xp=k_xp,
                hidden=hidden, hidden_p=hidden_p,
                dim_xbar=dim_xbar, dim_xbar_p=dim_xbar_p,
                matmul_dtype=jnp.dtype(matmul_dtype))


# --------------------------------------------------------------------------- #
# Tiling plan (generation-aware VMEM budget)
# --------------------------------------------------------------------------- #
def _vmem_capacity_bytes() -> int:
    try:
        return int(pltpu.get_tpu_info().vmem_capacity_bytes)
    except Exception:
        return 64 * 1024 * 1024     # conservative (v7x per-core) fallback


def _plan(n, k_x, k_xp, nb_p, hidden_p, dim_xbar_p, mm_bytes, out_bytes,
          tile_n_req, block_k_req, budget, plan):
    # >= 2 row tiles whenever N allows it (v7x: one per TensorCore).
    tn_cap = max(16, _round_up(pl.cdiv(n, 2), 16))
    tn = max(16, min(_round_up(tile_n_req, 16), tn_cap))
    tn_cands = []
    while True:
        tn_cands.append(tn)
        if tn <= 16:
            break
        tn = max(16, _round_up(tn // 2, 16))

    fixed = (2 * nb_p * hidden_p * mm_bytes             # W1[:num_batches] (resident)
             + 2 * hidden_p * dim_xbar_p * mm_bytes     # W2 (resident)
             + 2 * (hidden_p + dim_xbar_p) * 4)         # biases

    def per_row(k_lanes):
        return (2 * k_lanes * 4                         # x tile (f32), dbl-buffered
                + k_lanes * mm_bytes                    # in-kernel cast temp
                + 2 * nb_p * mm_bytes                   # batchEmb tile
                + 2 * dim_xbar_p * out_bytes            # output tile
                + 4 * hidden_p * 4)                     # h / layer-2 f32 temps

    def resident_fits(t):
        return fixed + 2 * k_xp * hidden_p * mm_bytes + t * per_row(k_xp) <= budget

    def kgrid_fits(t, kb):
        return fixed + 3 * kb * hidden_p * mm_bytes + t * per_row(kb) <= budget

    if plan in ("auto", "resident"):
        for t in tn_cands:
            if resident_fits(t):
                return "resident", t, k_xp
        if plan == "resident":
            return "resident", tn_cands[-1], k_xp       # honour the explicit request

    kb = max(128, min(_round_up(block_k_req, 128), k_xp))
    kb_cands = []
    while True:
        kb_cands.append(kb)
        if kb <= 128:
            break
        kb = max(128, _round_up(kb // 2, 128))
    for t in tn_cands:
        for kb in kb_cands:
            if kgrid_fits(t, kb):
                return "kgrid", t, kb
    return "kgrid", tn_cands[-1], kb_cands[-1]


# --------------------------------------------------------------------------- #
# Forward wrappers
# --------------------------------------------------------------------------- #
def encx2xbar_forward_prepared(x, ten_batchEmb, params, *,
                               tile_n=512, block_k=2048, plan="auto"):
    """Pallas forward equivalent to module_encX(cat([ten_batchEmb, x], 1))."""
    p = params
    n, num_gene = x.shape
    assert num_gene == p["k_x"], "x feature dim does not match prepared W1"
    nb, nb_p = p["num_batches"], p["nb_p"]
    hidden_p, dim_xbar_p = p["hidden_p"], p["dim_xbar_p"]
    k_x, k_xp = p["k_x"], p["k_xp"]
    mm_dtype = p["matmul_dtype"]
    out_dtype = x.dtype

    if ten_batchEmb.ndim == 1:                 # module's unsqueeze(-1) glue
        ten_batchEmb = ten_batchEmb[:, None]
    assert ten_batchEmb.shape == (n, nb)
    # Tiny per-call copy (N x 128): lane-pad the batch embedding so its matmul
    # uses a full 128-lane contraction.  x itself is NOT copied or padded.
    emb = jnp.pad(ten_batchEmb.astype(mm_dtype), ((0, 0), (0, nb_p - nb)))

    mm_bytes = mm_dtype.itemsize
    out_bytes = jnp.dtype(out_dtype).itemsize
    cap = _vmem_capacity_bytes()
    mode, tn, kb = _plan(n, k_x, k_xp, nb_p, hidden_p, dim_xbar_p,
                         mm_bytes, out_bytes, tile_n, block_k,
                         budget=int(0.7 * cap), plan=plan)

    row_tiles = pl.cdiv(n, tn)

    if mode == "resident":
        grid = (row_tiles,)
        kernel = functools.partial(_resident_kernel, k_x=k_x)
        in_specs = [
            pl.BlockSpec((tn, nb_p), lambda i: (i, 0)),               # batchEmb
            pl.BlockSpec((tn, k_xp), lambda i: (i, 0)),               # x (streamed)
            pl.BlockSpec((nb_p, hidden_p), lambda i: (0, 0)),         # W1[:nb] resident
            pl.BlockSpec((k_xp, hidden_p), lambda i: (0, 0)),         # W1[nb:] resident
            pl.BlockSpec((1, hidden_p), lambda i: (0, 0)),            # b1
            pl.BlockSpec((hidden_p, dim_xbar_p), lambda i: (0, 0)),   # W2 resident
            pl.BlockSpec((1, dim_xbar_p), lambda i: (0, 0)),          # b2
        ]
        out_specs = pl.BlockSpec((tn, dim_xbar_p), lambda i: (i, 0))
        scratch = []
        dims = ("parallel",)
        w1_hbm_bytes = p["w1x"].size * mm_bytes                       # loaded once
    else:
        k_tiles = pl.cdiv(k_x, kb)
        grid = (row_tiles, k_tiles)
        kernel = functools.partial(_kgrid_kernel, k_x=k_x, block_k=kb)
        in_specs = [
            pl.BlockSpec((tn, nb_p), lambda i, k: (i, 0)),            # batchEmb
            pl.BlockSpec((tn, kb), lambda i, k: (i, k)),              # x (streamed)
            pl.BlockSpec((nb_p, hidden_p), lambda i, k: (0, 0)),      # W1[:nb]
            pl.BlockSpec((kb, hidden_p), lambda i, k: (k, 0)),        # W1 K-block
            pl.BlockSpec((1, hidden_p), lambda i, k: (0, 0)),         # b1
            pl.BlockSpec((hidden_p, dim_xbar_p), lambda i, k: (0, 0)),# W2
            pl.BlockSpec((1, dim_xbar_p), lambda i, k: (0, 0)),       # b2
        ]
        out_specs = pl.BlockSpec((tn, dim_xbar_p), lambda i, k: (i, 0))
        scratch = [pltpu.VMEM((tn, hidden_p), jnp.float32)]
        dims = ("parallel", "arbitrary")
        # W1 is re-streamed once per row tile in this plan.
        w1_hbm_bytes = row_tiles * k_tiles * kb * hidden_p * mm_bytes

    cost = pl.CostEstimate(
        flops=2 * n * (nb_p + k_xp) * hidden_p + 2 * n * hidden_p * dim_xbar_p,
        transcendentals=0,
        bytes_accessed=int(x.size * jnp.dtype(x.dtype).itemsize
                           + emb.size * mm_bytes
                           + w1_hbm_bytes
                           + p["w1e"].size * mm_bytes + p["w2"].size * mm_bytes
                           + (hidden_p + dim_xbar_p) * 4
                           + n * dim_xbar_p * out_bytes))

    out_p = pl.pallas_call(
        kernel,
        out_shape=jax.ShapeDtypeStruct((n, dim_xbar_p), out_dtype),
        grid_spec=pltpu.PrefetchScalarGridSpec(
            num_scalar_prefetch=0,
            grid=grid,
            in_specs=in_specs,
            out_specs=out_specs,
            scratch_shapes=scratch,
        ),
        compiler_params=pltpu.CompilerParams(
            dimension_semantics=dims,
            vmem_limit_bytes=int(0.8 * cap)),
        cost_estimate=cost,
    )(emb, x, p["w1e"], p["w1x"], p["b1"], p["w2"], p["b2"])

    return out_p[:, :p["dim_xbar"]]


def encx2xbar_forward(x, ten_batchEmb, w1, b1, w2, b2, *,
                      matmul_dtype=jnp.bfloat16, **kwargs):
    """Convenience wrapper (prepares the weights on every call; in a loop call
    prepare_params once and reuse it via encx2xbar_forward_prepared)."""
    if ten_batchEmb.ndim == 1:
        ten_batchEmb = ten_batchEmb[:, None]
    params = prepare_params(w1, b1, w2, b2, ten_batchEmb.shape[1],
                            matmul_dtype=matmul_dtype)
    return encx2xbar_forward_prepared(x, ten_batchEmb, params, **kwargs)


def encx2xbar_reference(x, ten_batchEmb, w1, b1, w2, b2,
                        matmul_dtype=jnp.float32):
    """Pure-JAX reference; matmul_dtype mimics the kernel's operand precision."""
    hi = jax.lax.Precision.HIGHEST
    cat = jnp.concatenate([ten_batchEmb, x], axis=1)
    cat = cat.astype(matmul_dtype).astype(jnp.float32)
    w1f = w1.astype(matmul_dtype).astype(jnp.float32)
    w2f = w2.astype(matmul_dtype).astype(jnp.float32)
    h = jnp.maximum(jnp.dot(cat, w1f, precision=hi) + b1, 0.0)
    h = h.astype(matmul_dtype).astype(jnp.float32)
    return jnp.dot(h, w2f, precision=hi) + b2


# --------------------------------------------------------------------------- #
# Self-test
# --------------------------------------------------------------------------- #
if __name__ == "__main__":
    # Demo shapes consistent with the module's forward:
    #   x      : [N, num_gene]
    #   batch.y: [N, dim_u_int + dim_u_spl + dim_CT + dim_NCC + dim_BatchEmb]
    N = 16
    num_gene = 28
    num_batches = 4
    hidden = 32
    dim_xbar = 16
    flag_enable_batchEmb = True

    dim_u_int, dim_u_spl, dim_CT, dim_NCC, dim_BatchEmb = 3, 3, 5, 2, num_batches
    y_width = dim_u_int + dim_u_spl + dim_CT + dim_NCC + dim_BatchEmb

    key = jax.random.PRNGKey(0)
    kx, ky, kw1, kb1, kw2, kb2, kx2, ke2, kp2 = jax.random.split(key, 9)

    x = jax.random.normal(kx, (N, num_gene), dtype=jnp.float32)
    y = jax.random.normal(ky, (N, y_width), dtype=jnp.float32)

    # module_encX parameters (deterministic init, PyTorch-Linear-like scale)
    d_in = num_batches + num_gene
    w1 = jax.random.uniform(kw1, (d_in, hidden), dtype=jnp.float32,
                            minval=-1.0, maxval=1.0) / jnp.sqrt(d_in)
    b1 = jax.random.uniform(kb1, (hidden,), dtype=jnp.float32,
                            minval=-1.0, maxval=1.0) / jnp.sqrt(d_in)
    w2 = jax.random.uniform(kw2, (hidden, dim_xbar), dtype=jnp.float32,
                            minval=-1.0, maxval=1.0) / jnp.sqrt(hidden)
    b2 = jax.random.uniform(kb2, (dim_xbar,), dtype=jnp.float32,
                            minval=-1.0, maxval=1.0) / jnp.sqrt(hidden)

    # ten_batchEmb: slice of batch.y (host-side glue, as in the PyTorch forward)
    # TODO(synk): PyG NeighborLoader `batch` bookkeeping stays host-side glue.
    if flag_enable_batchEmb:
        start = dim_u_int + dim_u_spl + dim_CT + dim_NCC
        ten_batchEmb = y[:, start:start + dim_BatchEmb].astype(jnp.float32)
        assert ten_batchEmb.shape[1] == num_batches
    else:
        ten_batchEmb = jnp.zeros((N, num_batches), dtype=jnp.float32)

    # --- f32 path: exact match to module semantics ---------------------------
    params_f32 = prepare_params(w1, b1, w2, b2, num_batches,
                                matmul_dtype=jnp.float32)
    out_f32 = jax.block_until_ready(
        encx2xbar_forward_prepared(x, ten_batchEmb, params_f32))
    ref_f32 = encx2xbar_reference(x, ten_batchEmb, w1, b1, w2, b2)
    assert out_f32.shape == (N, dim_xbar)
    assert jnp.allclose(out_f32, ref_f32, atol=1e-5, rtol=1e-5), "f32 mismatch"

    # --- bf16 path (default, fast): match precision-equivalent reference -----
    params_bf16 = prepare_params(w1, b1, w2, b2, num_batches,
                                 matmul_dtype=jnp.bfloat16)
    out_bf16 = jax.block_until_ready(
        encx2xbar_forward_prepared(x, ten_batchEmb, params_bf16))
    ref_bf16 = encx2xbar_reference(x, ten_batchEmb, w1, b1, w2, b2,
                                   matmul_dtype=jnp.bfloat16)
    assert out_bf16.shape == (N, dim_xbar)
    assert jnp.allclose(out_bf16, ref_bf16, atol=1e-3, rtol=1e-3), "bf16 mismatch"
    assert jnp.allclose(out_bf16, ref_f32, atol=1e-1, rtol=1e-1), "bf16 far off"

    # --- second config: ragged sizes; exercises boundary row tiles, the
    # --- resident plan with lane-padded K, and the forced K-grid fallback ----
    N2, num_gene2, num_batches2, hidden2, dim_xbar2 = 100, 300, 3, 48, 24
    d_in2 = num_batches2 + num_gene2
    kk = jax.random.split(kp2, 4)
    x2 = jax.random.normal(kx2, (N2, num_gene2), dtype=jnp.float32)
    emb2 = jax.random.normal(ke2, (N2, num_batches2), dtype=jnp.float32)
    w1b = jax.random.normal(kk[0], (d_in2, hidden2), dtype=jnp.float32) / jnp.sqrt(d_in2)
    b1b = jax.random.normal(kk[1], (hidden2,), dtype=jnp.float32) * 0.1
    w2b = jax.random.normal(kk[2], (hidden2, dim_xbar2), dtype=jnp.float32) / jnp.sqrt(hidden2)
    b2b = jax.random.normal(kk[3], (dim_xbar2,), dtype=jnp.float32) * 0.1

    ref2 = encx2xbar_reference(x2, emb2, w1b, b1b, w2b, b2b)
    p2 = prepare_params(w1b, b1b, w2b, b2b, num_batches2,
                        matmul_dtype=jnp.float32)
    out2_res = jax.block_until_ready(
        encx2xbar_forward_prepared(x2, emb2, p2, tile_n=32, plan="resident"))
    out2_kg = jax.block_until_ready(
        encx2xbar_forward_prepared(x2, emb2, p2, tile_n=32, block_k=128,
                                   plan="kgrid"))
    assert out2_res.shape == (N2, dim_xbar2)
    assert out2_kg.shape == (N2, dim_xbar2)
    assert jnp.allclose(out2_res, ref2, atol=1e-4, rtol=1e-4), "resident mismatch"
    assert jnp.allclose(out2_kg, ref2, atol=1e-4, rtol=1e-4), "kgrid mismatch"

    print("KERNEL_OK")
</pallas_src>

<mosaic_0001>
module attributes {stable_mosaic.version = 11 : i64} {
  func.func @_resident_kernel(%arg0: i32, %arg1: memref<16x128xf32, #tpu.memory_space<vmem>>, %arg2: memref<16x128xf32, #tpu.memory_space<vmem>>, %arg3: memref<128x128xf32, #tpu.memory_space<vmem>>, %arg4: memref<128x128xf32, #tpu.memory_space<vmem>>, %arg5: memref<1x128xf32, #tpu.memory_space<vmem>>, %arg6: memref<128x128xf32, #tpu.memory_space<vmem>>, %arg7: memref<1x128xf32, #tpu.memory_space<vmem>>, %arg8: memref<16x128xf32, #tpu.memory_space<vmem>>) attributes {dimension_semantics = [#tpu.dimension_semantics<parallel>], iteration_bounds = array<i64: 1>, scalar_prefetch = 0 : i64, scratch_operands = 0 : i64, tpu.core_type = #tpu.core_type<tc>, window_params = [{transform_indices = @transform_0, window_bounds = array<i64: 16, 128>}, {transform_indices = @transform_1, window_bounds = array<i64: 16, 128>}, {pipeline_mode = #tpu.pipeline_mode<synchronous>, transform_indices = @transform_2, window_bounds = array<i64: 128, 128>}, {pipeline_mode = #tpu.pipeline_mode<synchronous>, transform_indices = @transform_3, window_bounds = array<i64: 128, 128>}, {pipeline_mode = #tpu.pipeline_mode<synchronous>, transform_indices = @transform_4, window_bounds = array<i64: 1, 128>}, {pipeline_mode = #tpu.pipeline_mode<synchronous>, transform_indices = @transform_5, window_bounds = array<i64: 128, 128>}, {pipeline_mode = #tpu.pipeline_mode<synchronous>, transform_indices = @transform_6, window_bounds = array<i64: 1, 128>}, {transform_indices = @transform_7, window_bounds = array<i64: 16, 128>}]} {
    %c0 = arith.constant 0 : index
    %c0_0 = arith.constant 0 : index
    %0 = vector.load %arg2[%c0, %c0_0] : memref<16x128xf32, #tpu.memory_space<vmem>>, vector<16x128xf32>
    %1 = tpu.iota {dimensions = array<i32: 1>} : vector<16x128xi32>
    %c28_i32 = arith.constant 28 : i32
    %2 = vector.broadcast %c28_i32 : i32 to vector<16x128xi32>
    %3 = arith.cmpi slt, %1, %2 : vector<16x128xi32>
    %cst = arith.constant 0.000000e+00 : f32
    %4 = vector.broadcast %cst : f32 to vector<16x128xf32>
    %5 = arith.select %3, %0, %4 : vector<16x128xi1>, vector<16x128xf32>
    %c0_1 = arith.constant 0 : index
    %c0_2 = arith.constant 0 : index
    %6 = vector.load %arg1[%c0_1, %c0_2] : memref<16x128xf32, #tpu.memory_space<vmem>>, vector<16x128xf32>
    %c0_3 = arith.constant 0 : index
    %c0_4 = arith.constant 0 : index
    %7 = vector.load %arg3[%c0_3, %c0_4] : memref<128x128xf32, #tpu.memory_space<vmem>>, vector<128x128xf32>
    %cst_5 = arith.constant dense<0.000000e+00> : vector<16x128xf32>
    %8 = tpu.matmul %6, %7, %cst_5 {dimension_numbers = #tpu.dot_dimension_numbers<[1], [0], [0], [1], [0, 0, 1, 1], [], []>} : vector<16x128xf32>, vector<128x128xf32>, vector<16x128xf32> -> vector<16x128xf32>
    %c0_6 = arith.constant 0 : index
    %c0_7 = arith.constant 0 : index
    %9 = vector.load %arg4[%c0_6, %c0_7] : memref<128x128xf32, #tpu.memory_space<vmem>>, vector<128x128xf32>
    %cst_8 = arith.constant dense<0.000000e+00> : vector<16x128xf32>
    %10 = tpu.matmul %5, %9, %cst_8 {dimension_numbers = #tpu.dot_dimension_numbers<[1], [0], [0], [1], [0, 0, 1, 1], [], []>} : vector<16x128xf32>, vector<128x128xf32>, vector<16x128xf32> -> vector<16x128xf32>
    %11 = arith.addf %8, %10 : vector<16x128xf32>
    %c0_9 = arith.constant 0 : index
    %c0_10 = arith.constant 0 : index
    %12 = vector.load %arg5[%c0_9, %c0_10] : memref<1x128xf32, #tpu.memory_space<vmem>>, vector<1x128xf32>
    %13 = vector.broadcast %12 : vector<1x128xf32> to vector<16x128xf32>
    %14 = arith.addf %11, %13 : vector<16x128xf32>
    %cst_11 = arith.constant 0.000000e+00 : f32
    %15 = vector.broadcast %cst_11 : f32 to vector<16x128xf32>
    %16 = arith.maximumf %14, %15 : vector<16x128xf32>
    %c0_12 = arith.constant 0 : index
    %c0_13 = arith.constant 0 : index
    %17 = vector.load %arg6[%c0_12, %c0_13] : memref<128x128xf32, #tpu.memory_space<vmem>>, vector<128x128xf32>
    %cst_14 = arith.constant dense<0.000000e+00> : vector<16x128xf32>
    %18 = tpu.matmul %16, %17, %cst_14 {dimension_numbers = #tpu.dot_dimension_numbers<[1], [0], [0], [1], [0, 0, 1, 1], [], []>} : vector<16x128xf32>, vector<128x128xf32>, vector<16x128xf32> -> vector<16x128xf32>
    %c0_15 = arith.constant 0 : index
    %c0_16 = arith.constant 0 : index
    %19 = vector.load %arg7[%c0_15, %c0_16] : memref<1x128xf32, #tpu.memory_space<vmem>>, vector<1x128xf32>
    %20 = vector.broadcast %19 : vector<1x128xf32> to vector<16x128xf32>
    %21 = arith.addf %18, %20 : vector<16x128xf32>
    %c0_17 = arith.constant 0 : index
    %c0_18 = arith.constant 0 : index
    %22 = vector.load %arg8[%c0_17, %c0_18] : memref<16x128xf32, #tpu.memory_space<vmem>>, vector<16x128xf32>
    tpu.vector_store %arg8[%c0_17, %c0_18], %21 {strides = array<i32>} : memref<16x128xf32, #tpu.memory_space<vmem>>, vector<16x128xf32>,
    return
  }
  func.func @transform_0(%arg0: i32) -> (i32, i32) {
    %c0_i32 = arith.constant 0 : i32
    %c0_i32_0 = arith.constant 0 : i32
    return %arg0, %c0_i32 : i32, i32
  }
  func.func @transform_1(%arg0: i32) -> (i32, i32) {
    %c0_i32 = arith.constant 0 : i32
    %c0_i32_0 = arith.constant 0 : i32
    return %arg0, %c0_i32 : i32, i32
  }
  func.func @transform_2(%arg0: i32) -> (i32, i32) {
    %c0_i32 = arith.constant 0 : i32
    %c0_i32_0 = arith.constant 0 : i32
    %c0_i32_1 = arith.constant 0 : i32
    return %c0_i32, %c0_i32_0 : i32, i32
  }
  func.func @transform_3(%arg0: i32) -> (i32, i32) {
    %c0_i32 = arith.constant 0 : i32
    %c0_i32_0 = arith.constant 0 : i32
    %c0_i32_1 = arith.constant 0 : i32
    return %c0_i32, %c0_i32_0 : i32, i32
  }
  func.func @transform_4(%arg0: i32) -> (i32, i32) {
    %c0_i32 = arith.constant 0 : i32
    %c0_i32_0 = arith.constant 0 : i32
    %c0_i32_1 = arith.constant 0 : i32
    return %c0_i32, %c0_i32_0 : i32, i32
  }
  func.func @transform_5(%arg0: i32) -> (i32, i32) {
    %c0_i32 = arith.constant 0 : i32
    %c0_i32_0 = arith.constant 0 : i32
    %c0_i32_1 = arith.constant 0 : i32
    return %c0_i32, %c0_i32_0 : i32, i32
  }
  func.func @transform_6(%arg0: i32) -> (i32, i32) {
    %c0_i32 = arith.constant 0 : i32
    %c0_i32_0 = arith.constant 0 : i32
    %c0_i32_1 = arith.constant 0 : i32
    return %c0_i32, %c0_i32_0 : i32, i32
  }
  func.func @transform_7(%arg0: i32) -> (i32, i32) {
    %c0_i32 = arith.constant 0 : i32
    %c0_i32_0 = arith.constant 0 : i32
    return %arg0, %c0_i32 : i32, i32
  }
}

</mosaic_0001>

<bundles_post_ra>
// kernel: tpu_custom_call.1
= control target key start
LH: loop header
LB: loop body
LE: loop exit
PB: predicated region body
PF: predicated region fallthrough
CT: control target
= control target key end

     0   :  { %12 = vsyncpa [#allocation3], 0  ;;  %s805_s0 = inlined_call_operand.hbm [shape: f32[16,128], index: 0, kind: input, shape index: {}]   ;;  %s806_s1 = inlined_call_operand.hbm [shape: f32[16,28], index: 1, kind: input, shape index: {}]   ;;  %s807_s2 = inlined_call_operand.hbm [shape: f32[128,128], index: 2, kind: input, shape index: {}]   ;;  %s808_s3 = inlined_call_operand.hbm [shape: f32[128,128], index: 3, kind: input, shape index: {}]   ;;  %s809_s4 = inlined_call_operand.vmem [shape: f32[1,128], index: 4, kind: input, shape index: {}]   ;;  %s810_s5 = inlined_call_operand.hbm [shape: f32[128,128], index: 5, kind: input, shape index: {}]   ;;  %s811_s6 = inlined_call_operand.vmem [shape: f32[1,128], index: 6, kind: input, shape index: {}]   ;;  %s812_s7 = inlined_call_operand.hbm [shape: f32[16,128], index: 7, kind: output, shape index: {}]  }
   0x1   :  { %13 = vsyncpa [#allocation6], 0 }
   0x2   :  { %14 = vsyncpa [#allocation9], 0 }
   0x3   :  { %15 = vsyncpa [#allocation4], 0  ;;  %s715_s24 = smov [#allocation5]   ;;  %s716_s26 = smov [#allocation8]  }
   0x4   :  { %s33_s25 = sshll.u32 %s715_s24, 4  ;;  %s57_s27 = sshll.u32 %s716_s26, 4  ;;  %s34_s25 = int_to_ptr.vmem [resolvable:$true] %s33_s25  ;;  %s58_s27 = int_to_ptr.vmem [resolvable:$true] %s57_s27 }
   0x5   :  { %s595_s28 = scalar_lea.vmem %s34_s25, 256  ;;  %p600_p1 = scmp.lt.s32.totalorder %s34_s25, %s34_s25 }
   0x6   :  { %p596_p0 = scmp.ne.s32.totalorder %s34_s25, %s595_s28  ;;  %p601_p2 = scmp.lt.s32.totalorder %s595_s28, %s595_s28 }
   0x8   :  { %p602_p3 = por %p601_p2, %p600_p1 }
   0xa   :  { %p603_p4 = pnand %p602_p3, %p596_p0 }
   0xc   :  { %606 = shalt.err (!%p603_p4)
}
   0xd   :  { %s717_s29 = smov 128   ;;  %s718_s30 = smov 8  }
   0xe   :  { %39 = dma.hbm_to_vmem [thread:$0]  %s806_s1, 256, %s34_s25, [#allocation6], %s717_s29, %s717_s29, %s718_s30  }
   0xf   :  { %s615_s10 = scalar_lea.vmem %s58_s27, 2048  ;;  %p620_p6 = scmp.lt.s32.totalorder %s58_s27, %s58_s27 }
  0x10   :  { %p616_p5 = scmp.ne.s32.totalorder %s58_s27, %s615_s10  ;;  %p621_p7 = scmp.lt.s32.totalorder %s615_s10, %s615_s10 }
  0x12   :  { %p622_p8 = por %p621_p7, %p620_p6 }
  0x14   :  { %p623_p9 = pnand %p622_p8, %p616_p5 }
  0x16   :  { %626 = shalt.err (!%p623_p9)
}
  0x17   :  { %63 = dma.hbm_to_vmem [thread:$0]  %s808_s3, 2048, %s58_s27, [#allocation9], %s717_s29, %s717_s29, %s718_s30  }
  0x18   :  { %s719_s13 = smov [#allocation2]   ;;  %s720_s15 = smov [#allocation7]  }
  0x19   :  { %s21_s14 = sshll.u32 %s719_s13, 4  ;;  %s45_s16 = sshll.u32 %s720_s15, 4  ;;  %s22_s14 = int_to_ptr.vmem [resolvable:$true] %s21_s14  ;;  %s46_s16 = int_to_ptr.vmem [resolvable:$true] %s45_s16 }
  0x1a   :  { %s635_s1 = scalar_lea.vmem %s22_s14, 256  ;;  %p640_p11 = scmp.lt.s32.totalorder %s22_s14, %s22_s14 }
  0x1b   :  { %p636_p10 = scmp.ne.s32.totalorder %s22_s14, %s635_s1  ;;  %p641_p12 = scmp.lt.s32.totalorder %s635_s1, %s635_s1 }
  0x1d   :  { %p642_p13 = por %p641_p12, %p640_p11 }
  0x1f   :  { %p643_p0 = pnand %p642_p13, %p636_p10 }
  0x21   :  { %646 = shalt.err (!%p643_p0)
}
  0x22   :  { %27 = dma.hbm_to_vmem [thread:$0]  %s805_s0, 256, %s22_s14, [#allocation3], %s717_s29, %s717_s29, %s718_s30  }
  0x23   :  { %s655_s3 = scalar_lea.vmem %s46_s16, 2048  ;;  %p660_p2 = scmp.lt.s32.totalorder %s46_s16, %s46_s16 }
  0x24   :  { %p656_p1 = scmp.ne.s32.totalorder %s46_s16, %s655_s3  ;;  %p661_p3 = scmp.lt.s32.totalorder %s655_s3, %s655_s3 }
  0x26   :  { %p662_p4 = por %p661_p3, %p660_p2 }
  0x28   :  { %p663_p5 = pnand %p662_p4, %p656_p1 }
  0x2a   :  { %666 = shalt.err (!%p663_p5)
}
  0x2b   :  { %51 = dma.hbm_to_vmem [thread:$0]  %s807_s2, 2048, %s46_s16, [#allocation6], %s717_s29, %s717_s29, %s718_s30  }
  0x2c   :  { %s721_s21 = smov [#allocation10]  }
  0x2d   :  { %s71_s22 = sshll.u32 %s721_s21, 4  ;;  %s72_s22 = int_to_ptr.vmem [resolvable:$true] %s71_s22 }
  0x2e   :  { %s675_s23 = scalar_lea.vmem %s72_s22, 2048  ;;  %p680_p7 = scmp.lt.s32.totalorder %s72_s22, %s72_s22 }
  0x2f   :  { %p676_p6 = scmp.ne.s32.totalorder %s72_s22, %s675_s23  ;;  %p681_p8 = scmp.lt.s32.totalorder %s675_s23, %s675_s23 }
  0x31   :  { %p682_p9 = por %p681_p8, %p680_p7 }
  0x33   :  { %p683_p10 = pnand %p682_p9, %p676_p6 }
  0x35   :  { %686 = shalt.err (!%p683_p10)
}
  0x36   :  { %77 = dma.hbm_to_vmem [thread:$0]  %s810_s5, 2048, %s72_s22, [#allocation9], %s717_s29, %s717_s29, %s718_s30  }
  0x37   :  { %707 = dma.done.wait [#allocation3], 256  }
  0x38   :  { %708 = vsyncadd [#allocation3], 4294967040 }
  0x39   :  { %709 = dma.done.wait [#allocation6], 2304  }
  0x3a   :  { %710 = vsyncadd [#allocation6], 4294964992 }
  0x3b   :  { %711 = dma.done.wait [#allocation9], 4096  }
  0x3c   :  { %712 = vsyncadd [#allocation9], 4294963200  ;;  %v135_v0 = vld [vmem:[#allocation8 + $0x78] sm:$0xff]  ;;  %v134_v2 = vld [vmem:[#allocation8 + $0x70] sm:$0xff]  ;;  %v97_v24 = vlaneseq  ;;  %s722_s27 = smov [#allocation11]  }
  0x3d   :  { %v119_v1 = vld [vmem:[#allocation7 + $0x78] sm:$0xff]  ;;  %474 = vmatprep.subr.mxu0 %v135_v0  ;;  %v118_v3 = vld [vmem:[#allocation7 + $0x70] sm:$0xff]  ;;  %v133_v4 = vld [vmem:[#allocation8 + $0x68] sm:$0xff]  ;;  %s402_s28 = sshll.u32 %s722_s27, 4  ;;  %s403_s28 = int_to_ptr.vmem [resolvable:$true] %s402_s28 }
  0x3e   :  { %509 = vmatprep.subr.mxu1 %v119_v1  ;;  %475 = vmatpush3.msra.mxu0 %v135_v0  ;;  %v117_v5 = vld [vmem:[#allocation7 + $0x68] sm:$0xff]  ;;  %v132_v6 = vld [vmem:[#allocation8 + $0x60] sm:$0xff]  ;;  %v131_v8 = vld [vmem:[#allocation8 + $0x58] sm:$0xff]  ;;  %v98_v29 = vand.u32 127, %v97_v24  ;;  %p692_p12 = scmp.lt.s32.totalorder %s403_s28, %s403_s28 }
  0x3f   :  { %510 = vmatpush3.msra.mxu1 %v119_v1  ;;  %476 = vmatprep.subr.mxu0 %v134_v2  ;;  %v116_v7 = vld [vmem:[#allocation7 + $0x60] sm:$0xff]  ;;  %v115_v9 = vld [vmem:[#allocation7 + $0x58] sm:$0xff]  ;;  %v130_v10 = vld [vmem:[#allocation8 + $0x50] sm:$0xff] }
  0x40   :  { %511 = vmatprep.subr.mxu1 %v118_v3  ;;  %477 = vmatpush3.msra.mxu0 %v134_v2  ;;  %v114_v11 = vld [vmem:[#allocation7 + $0x50] sm:$0xff]  ;;  %v129_v12 = vld [vmem:[#allocation8 + $0x48] sm:$0xff]  ;;  %v128_v14 = vld [vmem:[#allocation8 + $0x40] sm:$0xff]  ;;  %vm99_vm0 = vcmp.lt.s32.totalorder %v98_v29, 28 }
  0x41   :  { %512 = vmatpush3.msra.mxu1 %v118_v3  ;;  %478 = vmatprep.subr.mxu0 %v133_v4  ;;  %v113_v13 = vld [vmem:[#allocation7 + $0x48] sm:$0xff]  ;;  %v112_v15 = vld [vmem:[#allocation7 + $0x40] sm:$0xff]  ;;  %v127_v16 = vld [vmem:[#allocation8 + $0x38] sm:$0xff] }
  0x42   :  { %513 = vmatprep.subr.mxu1 %v117_v5  ;;  %479 = vmatpush3.msra.mxu0 %v133_v4  ;;  %v111_v17 = vld [vmem:[#allocation7 + $0x38] sm:$0xff]  ;;  %v126_v18 = vld [vmem:[#allocation8 + $0x30] sm:$0xff]  ;;  %v125_v20 = vld [vmem:[#allocation8 + $0x28] sm:$0xff] }
  0x43   :  { %514 = vmatpush3.msra.mxu1 %v117_v5  ;;  %480 = vmatprep.subr.mxu0 %v132_v6  ;;  %v110_v19 = vld [vmem:[#allocation7 + $0x30] sm:$0xff]  ;;  %v109_v21 = vld [vmem:[#allocation7 + $0x28] sm:$0xff]  ;;  %v124_v22 = vld [vmem:[#allocation8 + $0x20] sm:$0xff] }
  0x44   :  { %515 = vmatprep.subr.mxu1 %v116_v7  ;;  %481 = vmatpush3.msra.mxu0 %v132_v6  ;;  %v108_v23 = vld [vmem:[#allocation7 + $0x20] sm:$0xff]  ;;  %v123_v25 = vld [vmem:[#allocation8 + $0x18] sm:$0xff]  ;;  %v122_v27 = vld [vmem:[#allocation8 + $0x10] sm:$0xff] }
  0x45   :  { %516 = vmatpush3.msra.mxu1 %v116_v7  ;;  %482 = vmatprep.subr.mxu0 %v131_v8  ;;  %v107_v26 = vld [vmem:[#allocation7 + $0x18] sm:$0xff]  ;;  %v106_v28 = vld [vmem:[#allocation7 + $0x10] sm:$0xff]  ;;  %v121_v30 = vld [vmem:[#allocation8 + $0x8] sm:$0xff] }
  0x46   :  { %517 = vmatprep.subr.mxu1 %v115_v9  ;;  %483 = vmatpush3.msra.mxu0 %v131_v8  ;;  %v105_v31 = vld [vmem:[#allocation7 + $0x8] sm:$0xff]  ;;  %v120_v32 = vld [vmem:[#allocation8] sm:$0xff]  ;;  %v95_v34 = vld [vmem:[#allocation5] sm:$0xff] }
  0x47   :  { %518 = vmatpush3.msra.mxu1 %v115_v9  ;;  %484 = vmatprep.subr.mxu0 %v130_v10  ;;  %v104_v33 = vld [vmem:[#allocation7] sm:$0xff]  ;;  %v96_v36 = vld [vmem:[#allocation5 + $0x8] sm:$0xff]  ;;  %v103_v37 = vld [vmem:[#allocation2 + $0x8] sm:$0xff] }
  0x48   :  { %519 = vmatprep.subr.mxu1 %v114_v11  ;;  %485 = vmatpush3.msra.mxu0 %v130_v10  ;;  %v102_v35 = vld [vmem:[#allocation2] sm:$0xff]  ;;  %v312_v38 = vld [vmem:[#allocation10 + $0x78] sm:$0xff]  ;;  %v311_v39 = vld [vmem:[#allocation10 + $0x70] sm:$0xff] }
  0x49   :  { %520 = vmatpush3.msra.mxu1 %v114_v11  ;;  %486 = vmatprep.subr.mxu0 %v129_v12  ;;  %v310_v40 = vld [vmem:[#allocation10 + $0x68] sm:$0xff]  ;;  %v309_v41 = vld [vmem:[#allocation10 + $0x60] sm:$0xff]  ;;  %v308_v42 = vld [vmem:[#allocation10 + $0x58] sm:$0xff] }
  0x4a   :  { %521 = vmatprep.subr.mxu1 %v113_v13  ;;  %487 = vmatpush3.msra.mxu0 %v129_v12  ;;  %v307_v43 = vld [vmem:[#allocation10 + $0x50] sm:$0xff]  ;;  %v306_v44 = vld [vmem:[#allocation10 + $0x48] sm:$0xff]  ;;  %v305_v45 = vld [vmem:[#allocation10 + $0x40] sm:$0xff] }
  0x4b   :  { %522 = vmatpush3.msra.mxu1 %v113_v13  ;;  %488 = vmatprep.subr.mxu0 %v128_v14  ;;  %v304_v46 = vld [vmem:[#allocation10 + $0x38] sm:$0xff]  ;;  %v303_v47 = vld [vmem:[#allocation10 + $0x30] sm:$0xff]  ;;  %v302_v48 = vld [vmem:[#allocation10 + $0x28] sm:$0xff] }
  0x4c   :  { %523 = vmatprep.subr.mxu1 %v112_v15  ;;  %489 = vmatpush3.msra.mxu0 %v128_v14  ;;  %v301_v49 = vld [vmem:[#allocation10 + $0x20] sm:$0xff]  ;;  %v300_v50 = vld [vmem:[#allocation10 + $0x18] sm:$0xff]  ;;  %v299_v51 = vld [vmem:[#allocation10 + $0x10] sm:$0xff] }
  0x4d   :  { %524 = vmatpush3.msra.mxu1 %v112_v15  ;;  %490 = vmatprep.subr.mxu0 %v127_v16  ;;  %v298_v52 = vld [vmem:[#allocation10 + $0x8] sm:$0xff]  ;;  %v297_v53 = vld [vmem:[#allocation10] sm:$0xff] }
  0x4e   :  { %525 = vmatprep.subr.mxu1 %v111_v17  ;;  %491 = vmatpush3.msra.mxu0 %v127_v16  ;;  %v418_v57 = vld [vmem:[%s809_s4] ss:$0 sm:$0xff]  ;;  %s687_s4 = scalar_lea.vmem %s403_s28, 256 }
  0x4f   :  { %526 = vmatpush3.msra.mxu1 %v111_v17  ;;  %492 = vmatprep.subr.mxu0 %v126_v18  ;;  %v419_v1 = vld [vmem:[%s811_s6] ss:$0 sm:$0xff]  ;;  %p688_p11 = scmp.ne.s32.totalorder %s403_s28, %s687_s4  ;;  %p693_p13 = scmp.lt.s32.totalorder %s687_s4, %s687_s4 }
  0x50   :  { %527 = vmatprep.subr.mxu1 %v110_v19  ;;  %493 = vmatpush3.msra.mxu0 %v126_v18 }
  0x51   :  { %528 = vmatpush3.msra.mxu1 %v110_v19  ;;  %494 = vmatprep.subr.mxu0 %v125_v20  ;;  %p694_p0 = por %p693_p13, %p692_p12 }
  0x52   :  { %529 = vmatprep.subr.mxu1 %v109_v21  ;;  %495 = vmatpush3.msra.mxu0 %v125_v20 }
  0x53   :  { %530 = vmatpush3.msra.mxu1 %v109_v21  ;;  %496 = vmatprep.subr.mxu0 %v124_v22  ;;  %p695_p1 = pnand %p694_p0, %p688_p11 }
  0x54   :  { %531 = vmatprep.subr.mxu1 %v108_v23  ;;  %497 = vmatpush3.msra.mxu0 %v124_v22 }
  0x55   :  { %532 = vmatpush3.msra.mxu1 %v108_v23  ;;  %498 = vmatprep.subr.mxu0 %v123_v25 }
  0x56   :  { %533 = vmatprep.subr.mxu1 %v107_v26  ;;  %499 = vmatpush3.msra.mxu0 %v123_v25 }
  0x57   :  { %534 = vmatpush3.msra.mxu1 %v107_v26  ;;  %500 = vmatprep.subr.mxu0 %v122_v27 }
  0x58   :  { %535 = vmatprep.subr.mxu1 %v106_v28  ;;  %501 = vmatpush3.msra.mxu0 %v122_v27 }
  0x59   :  { %536 = vmatpush3.msra.mxu1 %v106_v28  ;;  %502 = vmatprep.subr.mxu0 %v121_v30 }
  0x5a   :  { %537 = vmatprep.subr.mxu1 %v105_v31  ;;  %503 = vmatpush3.msra.mxu0 %v121_v30 }
  0x5b   :  { %538 = vmatpush3.msra.mxu1 %v105_v31  ;;  %504 = vmatprep.subr.mxu0 %v120_v32 }
  0x5c   :  { %539 = vmatprep.subr.mxu1 %v104_v33  ;;  %505 = vmatpush3.msra.mxu0 %v120_v32 }
  0x5d   :  { %506 = vmatprep.mubr.msk.f32.mxu0 %vm99_vm0, %v95_v34  ;;  %540 = vmatpush3.msra.mxu1 %v104_v33 }
  0x5e   :  { %541 = vmatprep.mubr.f32.mxu1 %v102_v35  ;;  %507 = vmatmul.mubr.msk.f32.vlgmr.msra.gmra.mxu0 %vm99_vm0, %v96_v36 }
  0x5f   :  { %542 = vmatmul.mubr.f32.vlgmr.msra.gmra.mxu1 %v103_v37  ;;  %544 = vmatprep.subr.mxu0 %v312_v38 }
  0x60   :  { %545 = vmatpush3.msra.mxu0 %v312_v38 }
  0x61   :  { %546 = vmatprep.subr.mxu0 %v311_v39 }
  0x62   :  { %547 = vmatpush3.msra.mxu0 %v311_v39 }
  0x63   :  { %548 = vmatprep.subr.mxu0 %v310_v40 }
  0x64   :  { %549 = vmatpush3.msra.mxu0 %v310_v40 }
  0x65   :  { %550 = vmatprep.subr.mxu0 %v309_v41 }
  0x66   :  { %551 = vmatpush3.msra.mxu0 %v309_v41 }
  0x67   :  { %552 = vmatprep.subr.mxu0 %v308_v42 }
  0x68   :  { %553 = vmatpush3.msra.mxu0 %v308_v42 }
  0x69   :  { %554 = vmatprep.subr.mxu0 %v307_v43 }
  0x6a   :  { %555 = vmatpush3.msra.mxu0 %v307_v43 }
  0x6b   :  { %556 = vmatprep.subr.mxu0 %v306_v44 }
  0x6c   :  { %557 = vmatpush3.msra.mxu0 %v306_v44 }
  0x6d   :  { %558 = vmatprep.subr.mxu0 %v305_v45 }
  0x6e   :  { %559 = vmatpush3.msra.mxu0 %v305_v45 }
  0x6f   :  { %560 = vmatprep.subr.mxu0 %v304_v46 }
  0x70   :  { %561 = vmatpush3.msra.mxu0 %v304_v46 }
  0x71   :  { %562 = vmatprep.subr.mxu0 %v303_v47 }
  0x72   :  { %563 = vmatpush3.msra.mxu0 %v303_v47 }
  0x73   :  { %564 = vmatprep.subr.mxu0 %v302_v48 }
  0x74   :  { %565 = vmatpush3.msra.mxu0 %v302_v48 }
  0x75   :  { %566 = vmatprep.subr.mxu0 %v301_v49 }
  0x76   :  { %567 = vmatpush3.msra.mxu0 %v301_v49 }
  0x77   :  { %568 = vmatprep.subr.mxu0 %v300_v50 }
  0x78   :  { %569 = vmatpush3.msra.mxu0 %v300_v50 }
  0x79   :  { %570 = vmatprep.subr.mxu0 %v299_v51 }
  0x7a   :  { %571 = vmatpush3.msra.mxu0 %v299_v51 }
  0x7b   :  { %572 = vmatprep.subr.mxu0 %v298_v52 }
  0x7c   :  { %573 = vmatpush3.msra.mxu0 %v298_v52 }
  0x7d   :  { %574 = vmatprep.subr.mxu0 %v297_v53 }
  0x7e   :  { %575 = vmatpush3.msra.mxu0 %v297_v53 }
 0x11e   :  { %v508_v54 = vpop.f32.mrf.mxu0 }
 0x11f   :  { %v543_v55 = vpop.f32.mrf.mxu1 }
 0x120   :  { %v283_v56 = vadd.f32 %v543_v55, %v508_v54  ;;  %v202_v58 = vpop.f32.mrf.mxu0 }
 0x121   :  { %v277_v59 = vpop.f32.mrf.mxu1 }
 0x122   :  { %v278_v60 = vadd.f32 %v277_v59, %v202_v58  ;;  %v294_v61 = vadd.f32 %v418_v57, %v283_v56 }
 0x124   :  { %v293_v62 = vadd.f32 %v418_v57, %v278_v60  ;;  %v296_v0 = vmax.f32 %v294_v61, 0.0 }
 0x126   :  { %v295_v63 = vmax.f32 %v293_v62, 0.0 }
 0x128   :  { %576 = vmatprep.mubr.f32.mxu0 %v295_v63 }
 0x129   :  { %577 = vmatmul.mubr.f32.vlgmr.msra.gmra.mxu0 %v296_v0 }
 0x1e9   :  { %v578_v2 = vpop.f32.mrf.mxu0 }
 0x1ea   :  { %v392_v3 = vadd.f32 %v578_v2, %v419_v1 }
 0x1eb   :  { %v386_v4 = vpop.f32.mrf.mxu0 }
 0x1ec   :  { %396 = vst [vmem:[#allocation11 + $0x8] sm:$0xff] %v392_v3  ;;  %v387_v5 = vadd.f32 %v419_v1, %v386_v4 }
 0x1ee   :  { %395 = vst [vmem:[#allocation11] sm:$0xff] %v387_v5 }
 0x1ef   :  { %698 = shalt.err (!%p695_p1)
}
 0x1f0   :  { %408 = dma.vmem_to_hbm [thread:$0]  %s403_s28, 256, %s812_s7, [#allocation4], %s717_s29, %s717_s29, %s718_s30  }
 0x1f1   :  { %713 = dma.done.wait [#allocation4], 256  }
 0x1f2   :  { %714 = vsyncadd [#allocation4], 4294967040 }
 0x1f3   :  { %412 = vsyncpa [#allocation3], 1 }
 0x1f4   :  { %413 = vsyncpa [#allocation6], 1 }
 0x1f5   :  { %414 = vsyncpa [#allocation9], 1 }
 0x1f6   :  { %415 = vsyncpa [#allocation4], 1 }

</bundles_post_ra>
